<compile_context>
chip_gen: v6e
topology: v6e:2x2x1
jax: 0.10.0
libtpu: 0.0.40
codegen_flags: <defaults>
</compile_context>

<pallas_src>
import functools
import math

import jax
import jax.numpy as jnp
from jax import lax
from jax.experimental import pallas as pl
from jax.experimental.pallas import tpu as pltpu

_NEG_INF = -1e30                      # large finite negative: NaN-safe masking
_VMEM_LIMIT = 48 * 1024 * 1024        # fits v7x's 64 MiB VMEM with headroom; fine on v5e/v6e


def _pick_tile(n, target):
    """Largest tile <= target that divides n and is a multiple of 8 (else n itself)."""
    t = min(n, target)
    if t == n:
        return n
    t = (t // 8) * 8
    while t >= 8:
        if n % t == 0:
            return t
        t -= 8
    return n


# ---------------------------------------------------------------------------
# Tiled linear kernel:  y = x @ W + b   (used for fused QKV proj and out proj)
# ---------------------------------------------------------------------------
def _linear_kernel(x_ref, w_ref, b_ref, o_ref):
    y = jnp.dot(x_ref[...], w_ref[...], preferred_element_type=jnp.float32)
    o_ref[...] = (y + b_ref[...].astype(jnp.float32)).astype(o_ref.dtype)


def _linear(x2d, w, b):
    """x2d: (R, K), w: (K, N), b: (1, N) -> (R, N)."""
    R, K = x2d.shape
    N = w.shape[1]
    tm = _pick_tile(R, 512)
    # TODO(synk): weight/bias blocks are constant across the grid; single-buffering
    # them (pipeline_mode=pl.Buffered(1)) would halve their VMEM footprint.
    return pl.pallas_call(
        _linear_kernel,
        out_shape=jax.ShapeDtypeStruct((R, N), x2d.dtype),
        grid_spec=pltpu.PrefetchScalarGridSpec(
            num_scalar_prefetch=0,
            grid=(R // tm,),
            in_specs=[
                pl.BlockSpec((tm, K), lambda i: (i, 0)),
                pl.BlockSpec((K, N), lambda i: (0, 0)),
                pl.BlockSpec((1, N), lambda i: (0, 0)),
            ],
            out_specs=pl.BlockSpec((tm, N), lambda i: (i, 0)),
        ),
        compiler_params=pltpu.CompilerParams(
            dimension_semantics=("parallel",),
            vmem_limit_bytes=_VMEM_LIMIT),
    )(x2d, w, b)


# ---------------------------------------------------------------------------
# Flash-style causal attention kernel over (B, H, T, D) tensors
# ---------------------------------------------------------------------------
def _flash_attn_kernel(q_ref, k_ref, v_ref, o_ref, m_ref, l_ref, acc_ref, *, scale):
    qi = pl.program_id(2)          # q-tile index
    ki = pl.program_id(3)          # kv-tile index (innermost, "arbitrary")

    @pl.when(ki == 0)
    def _init():
        m_ref[...] = jnp.full_like(m_ref, -jnp.inf)
        l_ref[...] = jnp.zeros_like(l_ref)
        acc_ref[...] = jnp.zeros_like(acc_ref)

    def _update(apply_mask):
        # Fold the 1/sqrt(D) scale into the (tq, D) q tile (not the (tq,tk) scores).
        q = q_ref[...] * scale
        # q @ k^T without materializing a transpose (NT dot).
        s = lax.dot_general(q, k_ref[...], (((1,), (1,)), ((), ())),
                            preferred_element_type=jnp.float32)        # (tq, tk)
        if apply_mask:   # only the diagonal tile needs the causal compare+select
            tq, tk = s.shape
            row = lax.broadcasted_iota(jnp.int32, (tq, tk), 0)
            col = lax.broadcasted_iota(jnp.int32, (tq, tk), 1)
            s = jnp.where(col <= row, s, _NEG_INF)
        m_prev = m_ref[...]
        m_new = jnp.maximum(m_prev, jnp.max(s, axis=-1, keepdims=True))
        alpha = jnp.exp(m_prev - m_new)
        p = jnp.exp(s - m_new)
        l_ref[...] = alpha * l_ref[...] + jnp.sum(p, axis=-1, keepdims=True)
        acc_ref[...] = alpha * acc_ref[...] + jnp.dot(
            p.astype(v_ref.dtype), v_ref[...], preferred_element_type=jnp.float32)
        m_ref[...] = m_new

    # Off-diagonal lower-triangle tiles: no mask needed.
    @pl.when(ki < qi)
    def _off_diag():
        _update(apply_mask=False)

    # Diagonal tile: mask, then finalize (this is the last kv tile a causal q tile sees).
    # Tiles with ki > qi do nothing (fully masked -> skipped).
    @pl.when(ki == qi)
    def _diag_and_finalize():
        _update(apply_mask=True)
        # Normalize AFTER p@v: tq*D multiplies instead of tq*tk divides.
        # (approx=True is the production choice; exact here for the strict ref check.)
        inv = pl.reciprocal(l_ref[...], approx=False)
        o_ref[...] = (acc_ref[...] * inv).astype(o_ref.dtype)


def _flash_attention(q, k, v, *, q_tile=None):
    """q, k, v: (B, H, T, D) -> y: (B, H, T, D) with causal masking."""
    B, H, T, D = q.shape
    tile = q_tile if q_tile is not None else _pick_tile(T, 256)
    assert T % tile == 0, "q/kv tile must divide T"
    nt = T // tile
    scale = 1.0 / math.sqrt(D)

    kernel = functools.partial(_flash_attn_kernel, scale=scale)

    q_spec = pl.BlockSpec((None, None, tile, D), lambda b, h, qi, ki: (b, h, qi, 0))
    # Clamp the kv block index to qi so skipped (fully-masked) steps re-use the
    # previous block and issue no DMA.
    kv_spec = pl.BlockSpec((None, None, tile, D),
                           lambda b, h, qi, ki: (b, h, jnp.minimum(ki, qi), 0))
    out_spec = pl.BlockSpec((None, None, tile, D), lambda b, h, qi, ki: (b, h, qi, 0))

    # TODO(synk): for D < 128 (e.g. 64-wide heads) pack 2 heads per MXU call to
    # restore lane density on v6e/v7x's 256-wide MXU.
    return pl.pallas_call(
        kernel,
        out_shape=jax.ShapeDtypeStruct((B, H, T, D), q.dtype),
        grid_spec=pltpu.PrefetchScalarGridSpec(
            num_scalar_prefetch=0,
            grid=(B, H, nt, nt),
            in_specs=[q_spec, kv_spec, kv_spec],
            out_specs=out_spec,
            scratch_shapes=[
                pltpu.VMEM((tile, 1), jnp.float32),    # running max
                pltpu.VMEM((tile, 1), jnp.float32),    # running denominator
                pltpu.VMEM((tile, D), jnp.float32),    # f32 output accumulator
            ],
        ),
        compiler_params=pltpu.CompilerParams(
            dimension_semantics=("parallel", "parallel", "parallel", "arbitrary"),
            vmem_limit_bytes=_VMEM_LIMIT),
    )(q, k, v)


# ---------------------------------------------------------------------------
# Full module forward
# ---------------------------------------------------------------------------
def causal_self_attention(x, params, n_head, *, q_tile=None):
    """x: (B, T, C). params: nn.Linear-style (out, in) weights + (out,) biases."""
    B, T, C = x.shape
    assert C % n_head == 0
    D = C // n_head

    # Fuse Q/K/V into a single (C, 3C) weight + (1, 3C) bias (wrapper-side, one-time).
    wqkv = jnp.concatenate([params['wq'].T, params['wk'].T, params['wv'].T], axis=1)
    bqkv = jnp.concatenate([params['bq'], params['bk'], params['bv']]).reshape(1, 3 * C)
    wp = params['wp'].T
    bp = params['bp'].reshape(1, C)

    # 1) fused QKV projection on flattened rows (lane-dense (tm, 3C) output tiles).
    x_flat = x.reshape(B * T, C)
    qkv_flat = _linear(x_flat, wqkv, bqkv)                       # (B*T, 3C)

    # 2) head split — wrapper-side layout plumbing so kernels see contiguous (rows, D) slabs.
    qkv = qkv_flat.reshape(B, T, 3, n_head, D).transpose(2, 0, 3, 1, 4)   # (3, B, H, T, D)
    q, k, v = qkv[0], qkv[1], qkv[2]

    # 3) flash causal attention.
    # TODO(synk): attention dropout (training mode) not implemented; eval path only.
    y = _flash_attention(q, k, v, q_tile=q_tile)                 # (B, H, T, D)

    # 4) merge heads + output projection (resid_dropout is identity in eval).
    y_flat = y.transpose(0, 2, 1, 3).reshape(B * T, C)
    out = _linear(y_flat, wp, bp)                                # (B*T, C)
    return out.reshape(B, T, C)


# ---------------------------------------------------------------------------
# Pure-JAX reference (mirrors the PyTorch forward in eval mode)
# ---------------------------------------------------------------------------
def _reference(x, params, n_head):
    B, T, C = x.shape
    D = C // n_head
    q = x @ params['wq'].T + params['bq']
    k = x @ params['wk'].T + params['bk']
    v = x @ params['wv'].T + params['bv']
    q = q.reshape(B, T, n_head, D).transpose(0, 2, 1, 3)
    k = k.reshape(B, T, n_head, D).transpose(0, 2, 1, 3)
    v = v.reshape(B, T, n_head, D).transpose(0, 2, 1, 3)
    att = jnp.einsum('bhtd,bhsd->bhts', q, k) / math.sqrt(D)
    mask = jnp.tril(jnp.ones((T, T), dtype=bool))
    att = jnp.where(mask[None, None], att, -jnp.inf)
    att = jax.nn.softmax(att, axis=-1)
    y = jnp.einsum('bhts,bhsd->bhtd', att, v)
    y = y.transpose(0, 2, 1, 3).reshape(B, T, C)
    return y @ params['wp'].T + params['bp']


def _make_params(key, C):
    keys = jax.random.split(key, 8)
    bound = 1.0 / math.sqrt(C)   # PyTorch nn.Linear default init range
    names = ['wq', 'bq', 'wk', 'bk', 'wv', 'bv', 'wp', 'bp']
    params = {}
    for i, name in enumerate(names):
        shape = (C, C) if name.startswith('w') else (C,)
        params[name] = jax.random.uniform(keys[i], shape, jnp.float32, -bound, bound)
    return params


if __name__ == "__main__":
    root = jax.random.PRNGKey(0)

    # (B, T, C, n_head, q_tile): small module-consistent config plus one config that
    # actually exercises the multi-tile flash path (off-diag / diag / skipped tiles).
    configs = [
        (2, 8, 32, 4, None),
        (2, 128, 64, 4, 32),
    ]

    for (B, T, C, n_head, q_tile) in configs:
        kp, kx, root = jax.random.split(root, 3)
        params = _make_params(kp, C)
        x = jax.random.normal(kx, (B, T, C), jnp.float32)

        out = causal_self_attention(x, params, n_head, q_tile=q_tile)
        out = jax.block_until_ready(out)

        ref = _reference(x, params, n_head)
        assert out.shape == (B, T, C)
        max_err = float(jnp.max(jnp.abs(out - ref)))
        assert jnp.allclose(out, ref, atol=2e-4, rtol=2e-4), (
            f"mismatch vs reference (B={B},T={T},C={C},H={n_head}): max_err={max_err}")

    print("KERNEL_OK")
</pallas_src>

<mosaic_0001>
module attributes {stable_mosaic.version = 11 : i64} {
  func.func @_linear_kernel(%arg0: i32, %arg1: memref<16x32xf32, #tpu.memory_space<vmem>>, %arg2: memref<32x96xf32, #tpu.memory_space<vmem>>, %arg3: memref<1x96xf32, #tpu.memory_space<vmem>>, %arg4: memref<16x96xf32, #tpu.memory_space<vmem>>) attributes {dimension_semantics = [#tpu.dimension_semantics<parallel>], iteration_bounds = array<i64: 1>, scalar_prefetch = 0 : i64, scratch_operands = 0 : i64, tpu.core_type = #tpu.core_type<tc>, window_params = [{transform_indices = @transform_0, window_bounds = array<i64: 16, 32>}, {pipeline_mode = #tpu.pipeline_mode<synchronous>, transform_indices = @transform_1, window_bounds = array<i64: 32, 96>}, {pipeline_mode = #tpu.pipeline_mode<synchronous>, transform_indices = @transform_2, window_bounds = array<i64: 1, 96>}, {transform_indices = @transform_3, window_bounds = array<i64: 16, 96>}]} {
    %c0 = arith.constant 0 : index
    %c0_0 = arith.constant 0 : index
    %0 = vector.load %arg1[%c0, %c0_0] : memref<16x32xf32, #tpu.memory_space<vmem>>, vector<16x32xf32>
    %c0_1 = arith.constant 0 : index
    %c0_2 = arith.constant 0 : index
    %1 = vector.load %arg2[%c0_1, %c0_2] : memref<32x96xf32, #tpu.memory_space<vmem>>, vector<32x96xf32>
    %cst = arith.constant dense<0.000000e+00> : vector<16x96xf32>
    %2 = tpu.matmul %0, %1, %cst {dimension_numbers = #tpu.dot_dimension_numbers<[1], [0], [0], [1], [0, 0, 1, 1], [], []>} : vector<16x32xf32>, vector<32x96xf32>, vector<16x96xf32> -> vector<16x96xf32>
    %c0_3 = arith.constant 0 : index
    %c0_4 = arith.constant 0 : index
    %3 = vector.load %arg3[%c0_3, %c0_4] : memref<1x96xf32, #tpu.memory_space<vmem>>, vector<1x96xf32>
    %4 = vector.broadcast %3 : vector<1x96xf32> to vector<16x96xf32>
    %5 = arith.addf %2, %4 : vector<16x96xf32>
    %c0_5 = arith.constant 0 : index
    %c0_6 = arith.constant 0 : index
    %6 = vector.load %arg4[%c0_5, %c0_6] : memref<16x96xf32, #tpu.memory_space<vmem>>, vector<16x96xf32>
    tpu.vector_store %arg4[%c0_5, %c0_6], %5 {strides = array<i32>} : memref<16x96xf32, #tpu.memory_space<vmem>>, vector<16x96xf32>,
    return
  }
  func.func @transform_0(%arg0: i32) -> (i32, i32) {
    %c0_i32 = arith.constant 0 : i32
    %c0_i32_0 = arith.constant 0 : i32
    return %arg0, %c0_i32 : i32, i32
  }
  func.func @transform_1(%arg0: i32) -> (i32, i32) {
    %c0_i32 = arith.constant 0 : i32
    %c0_i32_0 = arith.constant 0 : i32
    %c0_i32_1 = arith.constant 0 : i32
    return %c0_i32, %c0_i32_0 : i32, i32
  }
  func.func @transform_2(%arg0: i32) -> (i32, i32) {
    %c0_i32 = arith.constant 0 : i32
    %c0_i32_0 = arith.constant 0 : i32
    %c0_i32_1 = arith.constant 0 : i32
    return %c0_i32, %c0_i32_0 : i32, i32
  }
  func.func @transform_3(%arg0: i32) -> (i32, i32) {
    %c0_i32 = arith.constant 0 : i32
    %c0_i32_0 = arith.constant 0 : i32
    return %arg0, %c0_i32 : i32, i32
  }
}

</mosaic_0001>

<bundles_post_ra>
// kernel: tpu_custom_call.1
= control target key start
LH: loop header
LB: loop body
LE: loop exit
PB: predicated region body
PF: predicated region fallthrough
CT: control target
= control target key end

     0   :  { %8 = vsyncpa [#allocation3], 0  ;;  %s298_s0 = inlined_call_operand.hbm [shape: f32[16,32], index: 0, kind: input, shape index: {}]   ;;  %s299_s1 = inlined_call_operand.hbm [shape: f32[32,96], index: 1, kind: input, shape index: {}]   ;;  %s300_s2 = inlined_call_operand.vmem [shape: f32[1,96], index: 2, kind: input, shape index: {}]   ;;  %s301_s3 = inlined_call_operand.hbm [shape: f32[16,96], index: 3, kind: output, shape index: {}]  }
   0x1   :  { %9 = vsyncpa [#allocation6], 0 }
   0x2   :  { %10 = vsyncpa [#allocation4], 0  ;;  %s250_s12 = smov [#allocation2]  }
   0x3   :  { %s16_s13 = sshll.u32 %s250_s12, 4  ;;  %s17_s13 = int_to_ptr.vmem [resolvable:$true] %s16_s13 }
   0x4   :  { %s192_s14 = scalar_lea.vmem %s17_s13, 256  ;;  %p197_p1 = scmp.lt.s32.totalorder %s17_s13, %s17_s13 }
   0x5   :  { %p193_p0 = scmp.ne.s32.totalorder %s17_s13, %s192_s14  ;;  %p198_p2 = scmp.lt.s32.totalorder %s192_s14, %s192_s14 }
   0x7   :  { %p199_p3 = por %p198_p2, %p197_p1 }
   0x9   :  { %p200_p4 = pnand %p199_p3, %p193_p0 }
   0xb   :  { %203 = shalt.err (!%p200_p4)
}
   0xc   :  { %s251_s15 = smov 128   ;;  %s252_s16 = smov 8  }
   0xd   :  { %22 = dma.hbm_to_vmem [thread:$0]  %s298_s0, 256, %s17_s13, [#allocation3], %s251_s15, %s251_s15, %s252_s16  }
   0xe   :  { %s253_s19 = smov [#allocation5]  }
   0xf   :  { %s28_s20 = sshll.u32 %s253_s19, 4  ;;  %s29_s20 = int_to_ptr.vmem [resolvable:$true] %s28_s20 }
  0x10   :  { %s212_s21 = scalar_lea.vmem %s29_s20, 512  ;;  %p217_p6 = scmp.lt.s32.totalorder %s29_s20, %s29_s20 }
  0x11   :  { %p213_p5 = scmp.ne.s32.totalorder %s29_s20, %s212_s21  ;;  %p218_p7 = scmp.lt.s32.totalorder %s212_s21, %s212_s21 }
  0x13   :  { %p219_p8 = por %p218_p7, %p217_p6 }
  0x15   :  { %p220_p9 = pnand %p219_p8, %p213_p5 }
  0x17   :  { %223 = shalt.err (!%p220_p9)
}
  0x18   :  { %34 = dma.hbm_to_vmem [thread:$0]  %s299_s1, 512, %s29_s20, [#allocation6], %s251_s15, %s251_s15, %s252_s16  }
  0x19   :  { %244 = dma.done.wait [#allocation3], 256  }
  0x1a   :  { %245 = vsyncadd [#allocation3], 4294967040 }
  0x1b   :  { %246 = dma.done.wait [#allocation6], 512  }
  0x1c   :  { %247 = vsyncadd [#allocation6], 4294966784  ;;  %vm56_vm0 = vcmask 261120   ;;  %v48_v0 = vld [vmem:[#allocation5 + $0x18] sm:$0xff]  ;;  %v47_v1 = vld [vmem:[#allocation5 + $0x10] sm:$0xff]  ;;  %vm138_vm1 = vcmask 785408  }
  0x1d   :  { %168 = vmatprep.subr.mxu0 %v48_v0  ;;  %v43_v2 = vld [vmem:[#allocation2] sm:$0xff]  ;;  %v46_v3 = vld [vmem:[#allocation5 + $0x8] sm:$0xff]  ;;  %v45_v4 = vld [vmem:[#allocation5] sm:$0xff]  ;;  %s254_s24 = smov [#allocation7]  }
  0x1e   :  { %169 = vmatpush3.msra.mxu0 %v48_v0  ;;  %176 = vmatprep.mubr.msk.f32.mxu0 %vm56_vm0, %v43_v2  ;;  %v44_v5 = vld [vmem:[#allocation2 + $0x8] sm:$0xff]  ;;  %v159_v6 = vld [vmem:[%s300_s2] ss:$0 sm:$0xff]  ;;  %s146_s25 = sshll.u32 %s254_s24, 4  ;;  %s147_s25 = int_to_ptr.vmem [resolvable:$true] %s146_s25 }
  0x1f   :  { %170 = vmatprep.subr.mxu0 %v47_v1  ;;  %s224_s26 = scalar_lea.vmem %s147_s25, 256  ;;  %p229_p11 = scmp.lt.s32.totalorder %s147_s25, %s147_s25 }
  0x20   :  { %171 = vmatpush3.msra.mxu0 %v47_v1  ;;  %p225_p10 = scmp.ne.s32.totalorder %s147_s25, %s224_s26  ;;  %p230_p12 = scmp.lt.s32.totalorder %s224_s26, %s224_s26 }
  0x21   :  { %172 = vmatprep.subr.mxu0 %v46_v3 }
  0x22   :  { %173 = vmatpush3.msra.mxu0 %v46_v3  ;;  %p231_p13 = por %p230_p12, %p229_p11 }
  0x23   :  { %174 = vmatprep.subr.mxu0 %v45_v4 }
  0x24   :  { %175 = vmatpush3.msra.mxu0 %v45_v4  ;;  %p232_p0 = pnand %p231_p13, %p225_p10 }
  0x25   :  { %177 = vmatmul.mubr.msk.f32.vlgmr.msra.gmra.mxu0 %vm56_vm0, %v44_v5 }
  0xe5   :  { %v178_v7 = vpop.f32.mrf.mxu0 }
  0xe6   :  { %v135_v8 = vadd.f32 %v178_v7, %v159_v6 }
  0xe7   :  { %v129_v9 = vpop.f32.mrf.mxu0 }
  0xe8   :  { %v130_v10 = vadd.f32 %v159_v6, %v129_v9  ;;  %140 = vst.msk [vmem:[#allocation7 + $0x8] sm:$0xff] %vm138_vm1, %v135_v8 }
  0xea   :  { %139 = vst.msk [vmem:[#allocation7] sm:$0xff] %vm138_vm1, %v130_v10 }
  0xeb   :  { %235 = shalt.err (!%p232_p0)
}
  0xec   :  { %152 = dma.vmem_to_hbm [thread:$0]  %s147_s25, 256, %s301_s3, [#allocation4], %s251_s15, %s251_s15, %s252_s16  }
  0xed   :  { %248 = dma.done.wait [#allocation4], 256  }
  0xee   :  { %249 = vsyncadd [#allocation4], 4294967040 }
  0xef   :  { %156 = vsyncpa [#allocation3], 1 }
  0xf0   :  { %157 = vsyncpa [#allocation6], 1 }
  0xf1   :  { %158 = vsyncpa [#allocation4], 1 }

</bundles_post_ra>
